<compile_context>
chip_gen: v7x
topology: tpu7x:2x2x1
jax: 0.10.0
libtpu: 0.0.40
codegen_flags: <defaults>
</compile_context>

<pallas_src>
import functools

import jax
import jax.numpy as jnp
from jax import lax
from jax.experimental import pallas as pl
from jax.experimental.pallas import tpu as pltpu


def _relu_conv3x3_kernel(x_ref, w_ref, b_ref, o_ref, *, H, W, Nb):
    # x_ref : (Nb, C, H*W)  relu/conv input, NCHW with spatial dims flattened (lane-dense)
    # w_ref : (C, 9*C)      conv weight, w_ref[co, (ky*3+kx)*C + ci] = W[co, ci, ky, kx]
    # b_ref : (C, 1)        conv bias (column, broadcasts along lanes)
    # o_ref : (Nb, C, H*W)  output, NCHW-flat (lane-dense store)
    C = x_ref.shape[1]
    HW = H * W

    # --- hoisted boundary masks (zero padding), one pre-combined mask per tap ---
    pos = lax.broadcasted_iota(jnp.int32, (1, HW), 1)     # flat spatial index p = y*W + x
    if (W & (W - 1)) == 0:
        col = pos & (W - 1)                               # x = p % W (W power of two)
    else:
        col = pos % W
    row_ok = {-1: pos >= W, 0: None, 1: pos < (H - 1) * W}
    col_ok = {-1: col >= 1, 0: None, 1: col < (W - 1)}
    tap_mask = {}
    for dy in (-1, 0, 1):
        for dx in (-1, 0, 1):
            r, c = row_ok[dy], col_ok[dx]
            if r is None:
                tap_mask[(dy, dx)] = c
            elif c is None:
                tap_mask[(dy, dx)] = r
            else:
                tap_mask[(dy, dx)] = jnp.logical_and(r, c)

    w = w_ref[...]          # (C, 9C), VMEM-resident across all grid steps
    b = b_ref[...]          # (C, 1)

    # Static unroll over the images folded into this grid step.
    for n in range(Nb):
        xr = jnp.maximum(x_ref[n], 0.0).astype(jnp.float32)   # relu, (C, HW) f32

        taps = []
        for ky in range(3):
            for kx in range(3):
                dy, dx = ky - 1, kx - 1
                s = dy * W + dx                                # flat offset of this tap
                # shifted[p] == xr[p + s] for in-bounds p (cheap XLU lane rotation)
                shifted = pltpu.roll(xr, (-s) % HW, axis=1) if s != 0 else xr
                m = tap_mask[(dy, dx)]
                if m is not None:                              # zero the padding positions
                    shifted = jnp.where(m, shifted, 0.0)
                taps.append(shifted)

        # im2col patch stays in registers: (9C, HW) at C=4 is ~10 vregs.
        patch = jnp.concatenate(taps, axis=0)                  # (9C, HW)

        # Single dense contraction over (tap, c_in): (C, 9C) @ (9C, HW) -> (C, HW).
        acc = jnp.dot(w, patch, preferred_element_type=jnp.float32)
        acc = acc + b                                          # bias broadcast along lanes
        o_ref[n] = acc.astype(o_ref.dtype)


def _pick_images_per_step(n):
    """Fold several images into one grid step (amortize ~0.35us/step overhead),
    but keep >= 2 grid steps so both v7x TensorCores get work when possible."""
    if n <= 1:
        return 1
    best = 1
    for d in range(1, n + 1):
        if n % d == 0 and n // d >= 2:
            best = d
    return best


def bn_relu_conv_forward(x_nchw, weight_oihw, bias, images_per_step=None):
    """Equivalent of _bn_relu_conv(nb_filter).forward for NCHW float32 input."""
    N, C, H, W = x_nchw.shape
    C_out = weight_oihw.shape[0]
    HW = H * W

    Nb = _pick_images_per_step(N) if images_per_step is None else images_per_step
    assert N % Nb == 0, "images_per_step must divide the batch size"

    # Free reshapes (contiguous dims merged / split): no extra HBM passes.
    x_flat = x_nchw.reshape(N, C, HW)
    # Dense weight repack (tiny, done once): OIHW -> (C_out, 9*C_in) matching im2col rows.
    w_mat = jnp.transpose(weight_oihw, (0, 2, 3, 1)).reshape(C_out, 9 * C)
    b_col = bias.reshape(C_out, 1)

    kernel = functools.partial(_relu_conv3x3_kernel, H=H, W=W, Nb=Nb)

    out_flat = pl.pallas_call(
        kernel,
        out_shape=jax.ShapeDtypeStruct((N, C_out, HW), x_nchw.dtype),
        grid_spec=pltpu.PrefetchScalarGridSpec(
            num_scalar_prefetch=0,
            grid=(N // Nb,),
            in_specs=[
                pl.BlockSpec((Nb, C, HW), lambda n: (n, 0, 0)),
                pl.BlockSpec((C_out, 9 * C), lambda n: (0, 0)),
                pl.BlockSpec((C_out, 1), lambda n: (0, 0)),
            ],
            out_specs=pl.BlockSpec((Nb, C_out, HW), lambda n: (n, 0, 0)),
        ),
        compiler_params=pltpu.CompilerParams(
            dimension_semantics=("parallel",)),
    )(x_flat, w_mat, b_col)

    return out_flat.reshape(N, C_out, H, W)


def _reference(x_nchw, weight_oihw, bias):
    xr = jnp.maximum(x_nchw, 0.0)
    out = lax.conv_general_dilated(
        xr, weight_oihw,
        window_strides=(1, 1), padding=((1, 1), (1, 1)),
        dimension_numbers=("NCHW", "OIHW", "NCHW"))
    return out + bias[None, :, None, None]


if __name__ == "__main__":
    # small shapes consistent with the module: nb_filter = C = 4
    N, C, H, W = 2, 4, 16, 16

    key = jax.random.PRNGKey(0)
    kx, kw, kb = jax.random.split(key, 3)

    x = jax.random.normal(kx, (N, C, H, W), dtype=jnp.float32)
    # deterministic synthetic parameters (Conv2d(C, C, 3, 3) with bias)
    weight = 0.1 * jax.random.normal(kw, (C, C, 3, 3), dtype=jnp.float32)
    bias = 0.1 * jax.random.normal(kb, (C,), dtype=jnp.float32)

    out = bn_relu_conv_forward(x, weight, bias)
    out = jax.block_until_ready(out)

    ref = _reference(x, weight, bias)
    assert out.shape == (N, C, H, W)
    assert jnp.allclose(out, ref, atol=1e-4, rtol=1e-4), "mismatch vs reference conv"

    print("KERNEL_OK")
</pallas_src>

<mosaic_0001>
module attributes {stable_mosaic.version = 11 : i64} {
  func.func @_relu_conv3x3_kernel(%arg0: i32, %arg1: memref<1x4x256xf32, #tpu.memory_space<vmem>>, %arg2: memref<4x36xf32, #tpu.memory_space<vmem>>, %arg3: memref<4x1xf32, #tpu.memory_space<vmem>>, %arg4: memref<1x4x256xf32, #tpu.memory_space<vmem>>) attributes {dimension_semantics = [#tpu.dimension_semantics<parallel>], iteration_bounds = array<i64: 2>, scalar_prefetch = 0 : i64, scratch_operands = 0 : i64, tpu.core_type = #tpu.core_type<tc>, window_params = [{transform_indices = @transform_0, window_bounds = array<i64: 1, 4, 256>}, {pipeline_mode = #tpu.pipeline_mode<synchronous>, transform_indices = @transform_1, window_bounds = array<i64: 4, 36>}, {pipeline_mode = #tpu.pipeline_mode<synchronous>, transform_indices = @transform_2, window_bounds = array<i64: 4, 1>}, {transform_indices = @transform_3, window_bounds = array<i64: 1, 4, 256>}]} {
    %0 = tpu.iota {dimensions = array<i32: 1>} : vector<1x256xi32>
    %c15_i32 = arith.constant 15 : i32
    %1 = vector.broadcast %c15_i32 : i32 to vector<1x256xi32>
    %2 = arith.andi %0, %1 : vector<1x256xi32>
    %c16_i32 = arith.constant 16 : i32
    %3 = vector.broadcast %c16_i32 : i32 to vector<1x256xi32>
    %4 = arith.cmpi sge, %0, %3 : vector<1x256xi32>
    %c240_i32 = arith.constant 240 : i32
    %5 = vector.broadcast %c240_i32 : i32 to vector<1x256xi32>
    %6 = arith.cmpi slt, %0, %5 : vector<1x256xi32>
    %c1_i32 = arith.constant 1 : i32
    %7 = vector.broadcast %c1_i32 : i32 to vector<1x256xi32>
    %8 = arith.cmpi sge, %2, %7 : vector<1x256xi32>
    %c15_i32_0 = arith.constant 15 : i32
    %9 = vector.broadcast %c15_i32_0 : i32 to vector<1x256xi32>
    %10 = arith.cmpi slt, %2, %9 : vector<1x256xi32>
    %11 = arith.andi %4, %8 : vector<1x256xi1>
    %12 = arith.andi %4, %10 : vector<1x256xi1>
    %13 = arith.andi %6, %8 : vector<1x256xi1>
    %14 = arith.andi %6, %10 : vector<1x256xi1>
    %c0 = arith.constant 0 : index
    %c0_1 = arith.constant 0 : index
    %15 = vector.load %arg2[%c0, %c0_1] : memref<4x36xf32, #tpu.memory_space<vmem>>, vector<4x36xf32>
    %c0_2 = arith.constant 0 : index
    %c0_3 = arith.constant 0 : index
    %16 = vector.load %arg3[%c0_2, %c0_3] : memref<4x1xf32, #tpu.memory_space<vmem>>, vector<4x1xf32>
    %c0_4 = arith.constant 0 : index
    %c0_5 = arith.constant 0 : index
    %c0_6 = arith.constant 0 : index
    %17 = vector.load %arg1[%c0_4, %c0_5, %c0_6] : memref<1x4x256xf32, #tpu.memory_space<vmem>>, vector<1x4x256xf32>
    %18 = vector.shape_cast %17 : vector<1x4x256xf32> to vector<4x256xf32>
    %cst = arith.constant 0.000000e+00 : f32
    %19 = vector.broadcast %cst : f32 to vector<4x256xf32>
    %20 = arith.maximumf %18, %19 : vector<4x256xf32>
    %c17_i32 = arith.constant 17 : i32
    %21 = tpu.dynamic_rotate %20 by %c17_i32 dim 1 : vector<4x256xf32>, i32 -> vector<4x256xf32>
    %cst_7 = arith.constant 0.000000e+00 : f32
    %22 = vector.shape_cast %11 : vector<1x256xi1> to vector<1x256xi1>
    %23 = vector.broadcast %22 : vector<1x256xi1> to vector<4x256xi1>
    %24 = vector.broadcast %cst_7 : f32 to vector<4x256xf32>
    %25 = arith.select %23, %21, %24 : vector<4x256xi1>, vector<4x256xf32>
    %c16_i32_8 = arith.constant 16 : i32
    %26 = tpu.dynamic_rotate %20 by %c16_i32_8 dim 1 : vector<4x256xf32>, i32 -> vector<4x256xf32>
    %cst_9 = arith.constant 0.000000e+00 : f32
    %27 = vector.shape_cast %4 : vector<1x256xi1> to vector<1x256xi1>
    %28 = vector.broadcast %27 : vector<1x256xi1> to vector<4x256xi1>
    %29 = vector.broadcast %cst_9 : f32 to vector<4x256xf32>
    %30 = arith.select %28, %26, %29 : vector<4x256xi1>, vector<4x256xf32>
    %c15_i32_10 = arith.constant 15 : i32
    %31 = tpu.dynamic_rotate %20 by %c15_i32_10 dim 1 : vector<4x256xf32>, i32 -> vector<4x256xf32>
    %cst_11 = arith.constant 0.000000e+00 : f32
    %32 = vector.shape_cast %12 : vector<1x256xi1> to vector<1x256xi1>
    %33 = vector.broadcast %32 : vector<1x256xi1> to vector<4x256xi1>
    %34 = vector.broadcast %cst_11 : f32 to vector<4x256xf32>
    %35 = arith.select %33, %31, %34 : vector<4x256xi1>, vector<4x256xf32>
    %c1_i32_12 = arith.constant 1 : i32
    %36 = tpu.dynamic_rotate %20 by %c1_i32_12 dim 1 : vector<4x256xf32>, i32 -> vector<4x256xf32>
    %cst_13 = arith.constant 0.000000e+00 : f32
    %37 = vector.shape_cast %8 : vector<1x256xi1> to vector<1x256xi1>
    %38 = vector.broadcast %37 : vector<1x256xi1> to vector<4x256xi1>
    %39 = vector.broadcast %cst_13 : f32 to vector<4x256xf32>
    %40 = arith.select %38, %36, %39 : vector<4x256xi1>, vector<4x256xf32>
    %c255_i32 = arith.constant 255 : i32
    %41 = tpu.dynamic_rotate %20 by %c255_i32 dim 1 : vector<4x256xf32>, i32 -> vector<4x256xf32>
    %cst_14 = arith.constant 0.000000e+00 : f32
    %42 = vector.shape_cast %10 : vector<1x256xi1> to vector<1x256xi1>
    %43 = vector.broadcast %42 : vector<1x256xi1> to vector<4x256xi1>
    %44 = vector.broadcast %cst_14 : f32 to vector<4x256xf32>
    %45 = arith.select %43, %41, %44 : vector<4x256xi1>, vector<4x256xf32>
    %c241_i32 = arith.constant 241 : i32
    %46 = tpu.dynamic_rotate %20 by %c241_i32 dim 1 : vector<4x256xf32>, i32 -> vector<4x256xf32>
    %cst_15 = arith.constant 0.000000e+00 : f32
    %47 = vector.shape_cast %13 : vector<1x256xi1> to vector<1x256xi1>
    %48 = vector.broadcast %47 : vector<1x256xi1> to vector<4x256xi1>
    %49 = vector.broadcast %cst_15 : f32 to vector<4x256xf32>
    %50 = arith.select %48, %46, %49 : vector<4x256xi1>, vector<4x256xf32>
    %c240_i32_16 = arith.constant 240 : i32
    %51 = tpu.dynamic_rotate %20 by %c240_i32_16 dim 1 : vector<4x256xf32>, i32 -> vector<4x256xf32>
    %cst_17 = arith.constant 0.000000e+00 : f32
    %52 = vector.shape_cast %6 : vector<1x256xi1> to vector<1x256xi1>
    %53 = vector.broadcast %52 : vector<1x256xi1> to vector<4x256xi1>
    %54 = vector.broadcast %cst_17 : f32 to vector<4x256xf32>
    %55 = arith.select %53, %51, %54 : vector<4x256xi1>, vector<4x256xf32>
    %c239_i32 = arith.constant 239 : i32
    %56 = tpu.dynamic_rotate %20 by %c239_i32 dim 1 : vector<4x256xf32>, i32 -> vector<4x256xf32>
    %cst_18 = arith.constant 0.000000e+00 : f32
    %57 = vector.shape_cast %14 : vector<1x256xi1> to vector<1x256xi1>
    %58 = vector.broadcast %57 : vector<1x256xi1> to vector<4x256xi1>
    %59 = vector.broadcast %cst_18 : f32 to vector<4x256xf32>
    %60 = arith.select %58, %56, %59 : vector<4x256xi1>, vector<4x256xf32>
    %61 = tpu.concatenate %25, %30, %35, %40, %20, %45, %50, %55, %60 in 0 : vector<4x256xf32>, vector<4x256xf32>, vector<4x256xf32>, vector<4x256xf32>, vector<4x256xf32>, vector<4x256xf32>, vector<4x256xf32>, vector<4x256xf32>, vector<4x256xf32> -> vector<36x256xf32>
    %cst_19 = arith.constant dense<0.000000e+00> : vector<4x256xf32>
    %62 = tpu.matmul %15, %61, %cst_19 {dimension_numbers = #tpu.dot_dimension_numbers<[1], [0], [0], [1], [0, 0, 1, 1], [], []>} : vector<4x36xf32>, vector<36x256xf32>, vector<4x256xf32> -> vector<4x256xf32>
    %63 = vector.broadcast %16 : vector<4x1xf32> to vector<4x256xf32>
    %64 = arith.addf %62, %63 : vector<4x256xf32>
    %c0_20 = arith.constant 0 : index
    %c0_21 = arith.constant 0 : index
    %c0_22 = arith.constant 0 : index
    %65 = vector.load %arg4[%c0_20, %c0_21, %c0_22] : memref<1x4x256xf32, #tpu.memory_space<vmem>>, vector<1x4x256xf32>
    %66 = vector.shape_cast %65 : vector<1x4x256xf32> to vector<4x256xf32>
    %67 = vector.shape_cast %64 : vector<4x256xf32> to vector<1x4x256xf32>
    tpu.vector_store %arg4[%c0_20, %c0_21, %c0_22], %67 {strides = array<i32>} : memref<1x4x256xf32, #tpu.memory_space<vmem>>, vector<1x4x256xf32>,
    return
  }
  func.func @transform_0(%arg0: i32) -> (i32, i32, i32) {
    %c0_i32 = arith.constant 0 : i32
    %c0_i32_0 = arith.constant 0 : i32
    %c0_i32_1 = arith.constant 0 : i32
    return %arg0, %c0_i32, %c0_i32_0 : i32, i32, i32
  }
  func.func @transform_1(%arg0: i32) -> (i32, i32) {
    %c0_i32 = arith.constant 0 : i32
    %c0_i32_0 = arith.constant 0 : i32
    %c0_i32_1 = arith.constant 0 : i32
    return %c0_i32, %c0_i32_0 : i32, i32
  }
  func.func @transform_2(%arg0: i32) -> (i32, i32) {
    %c0_i32 = arith.constant 0 : i32
    %c0_i32_0 = arith.constant 0 : i32
    %c0_i32_1 = arith.constant 0 : i32
    return %c0_i32, %c0_i32_0 : i32, i32
  }
  func.func @transform_3(%arg0: i32) -> (i32, i32, i32) {
    %c0_i32 = arith.constant 0 : i32
    %c0_i32_0 = arith.constant 0 : i32
    %c0_i32_1 = arith.constant 0 : i32
    return %arg0, %c0_i32, %c0_i32_0 : i32, i32, i32
  }
}

</mosaic_0001>

<bundles_post_ra>
// kernel: tpu_custom_call.1
= control target key start
LH: loop header
LB: loop body
LE: loop exit
PB: predicated region body
PF: predicated region fallthrough
CT: control target
= control target key end

     0   :  { %8 = vsyncpa [#allocation3], 0  ;;  %s1096_s0 = inlined_call_operand.hbm [shape: f32[2,4,256], index: 0, kind: input, shape index: {}]   ;;  %s1097_s1 = inlined_call_operand.vmem [shape: f32[4,36], index: 1, kind: input, shape index: {}]   ;;  %s1098_s2 = inlined_call_operand.vmem [shape: f32[4,1], index: 2, kind: input, shape index: {}]   ;;  %s1099_s3 = inlined_call_operand.hbm [shape: f32[2,4,256], index: 3, kind: output, shape index: {}]  }
   0x1   :  { %10 = vsyncpa [#allocation3 + $0x1], 0 }
   0x2   :  { %11 = vsyncpa [#allocation4], 0 }
   0x3   :  { %13 = vsyncpa [#allocation4 + $0x1], 0  ;;  %s778_s12 = smov 0   ;;  %s780_s13 = smov 0  }
   0x4   :  { %s782_s14 = smov 0   ;;  %s784_s15 = smov 0  }
   0x5 LB: > { %s799_s16 = sadd.s32 4294967295, %s744_s15   ;;  %s528_s17 = sadd.s32 4294967294, %s744_s15   ;;  %s744_s15 = sphi %s784_s15, %s1130_s15   ;;  %s740_s14 = sphi %s782_s14, %s1129_s14   ;;  %s736_s13 = sphi %s780_s13, %s1128_s13   ;;  %s732_s12 = sphi %s778_s12, %s1127_s12  }
   0x6   : > { %s803_s18 = sadd.s32 1, %s744_s15   ;;  %s26_s19 = sadd.s32 1, %s740_s14 }
   0x7   : > { %s23_s20 = ssub.s32 %s744_s15, %s803_s18  ;;  %p33_p0 = scmp.ne.s32.totalorder %s740_s14, %s736_s13 }
   0x8   : > { %p24_p1 = scmp.eq.s32.totalorder %s23_s20, 0  ;;  %p34_p2 = scmp.eq.s32.totalorder %s744_s15, 0 }
   0x9   : > { %p39_p3 = scmp.ne.s32.totalorder %s736_s13, %s732_s12  ;;  %p40_p4 = scmp.eq.s32.totalorder %s799_s16, 0 }
   0xa   : > { %s815_s21 = scalar_select %p24_p1, %s740_s14, %s26_s19  }
   0xb   : > { %p817_p5 = por %p34_p2, %p33_p0  ;;  %p821_p6 = por %p40_p4, %p39_p3 }
   0xc   : > { %p105_p7 = scmp.eq.s32.totalorder %s799_s16, 1  ;;  %p111_p8 = scmp.eq.s32.totalorder %s528_s17, 1 }
   0xd   : > { %p567_p10 = scmp.lt.s32.totalorder %s744_s15, 2  ;;  %s137_s26 = sand.u32 1, %s740_s14  }
   0xe   : > { %p828_p11 = por %p105_p7, %p33_p0  ;;  %p832_p12 = por %p111_p8, %p39_p3 }
   0xf   : > { %s545_s27 = sshll.u32 %s744_s15, 7  ;;  %s531_s28 = sshll.u32 %s137_s26, 3 }
  0x10   : > { %s1103_s24 = scalar_select %p828_p11, 1, 0 }
  0x11   : > { %s1104_s25 = scalar_select %p832_p12, 1, 0 }
  0x12   : > { %s841_s4 = scalar_lea.hbm %s1096_s0, %s545_s27  ;;  %s141_s5 = scalar_lea.vmem [#allocation2], %s531_s28 }
  0x13   : > { %s149_s6 = sshll.u32 %s141_s5, 4  ;;  %p845_p13 = pnand %p567_p10, %p817_p5  ;;  %s849_s6 = int_to_ptr.vmem [resolvable:$true] %s149_s6 }
  0x14   : > { %s138_s8 = scalar_lea.sflag [#allocation3], %s137_s26  ;;  %s648_s9 = scalar_lea.hbm %s841_s4, 128 }
  0x15   : > { %p649_p2 = scmp.ne.s32.totalorder %s841_s4, %s648_s9  ;;  %p650_p3 = pneg %p845_p13 }
  0x16   : > { %s653_s17 = scalar_lea.hbm %s1096_s0, 256  ;;  %p654_p5 = scmp.lt.u32.totalorder %s841_s4, %s1096_s0 }
  0x17   : > { %p651_p4 = pnand %p650_p3, %p649_p2  ;;  %p655_p8 = scmp.lt.u32.totalorder %s653_s17, %s648_s9 }
  0x18   : > { %p657_p9 = scmp.lt.u32.totalorder %s648_s9, %s841_s4 }
  0x19   : > { %p652_p7 = pneg %p651_p4  ;;  %p656_p10 = por %p655_p8, %p654_p5 }
  0x1b   : > { %p658_p0 = por %p657_p9, %p656_p10 }
  0x1d   : > { %p659_p1 = pnand %p658_p0, %p652_p7 }
  0x1f   : > { %662 = shalt.err (!%p659_p1)
}
  0x20   : > { %s663_s22 = scalar_lea.vmem %s849_s6, 128  ;;  %s746_s26 = smov [#allocation2]  }
  0x21   : > { %p664_p2 = scmp.ne.s32.totalorder %s849_s6, %s663_s22  ;;  %s668_s27 = sshll.u32 %s746_s26, 4  ;;  %s669_s27 = int_to_ptr.vmem [resolvable:$false] %s668_s27 }
  0x22   : > { %s670_s28 = scalar_lea.vmem %s669_s27, 256  ;;  %p671_p11 = scmp.lt.s32.totalorder %s849_s6, %s669_s27 }
  0x23   : > { %p666_p4 = pnand %p664_p2, %p650_p3  ;;  %p672_p5 = scmp.lt.s32.totalorder %s670_s28, %s663_s22 }
  0x25   : > { %p667_p12 = pneg %p666_p4  ;;  %p673_p8 = por %p672_p5, %p671_p11 }
  0x27   : > { %p674_p9 = pnand %p673_p8, %p667_p12 }
  0x29   : > { %677 = shalt.err (!%p674_p9)
}
  0x2a   : > { %562 = dma.hbm_to_vmem [thread:$0]  (!%p845_p13), %s841_s4, 128, %s849_s6, %s138_s8  }
  0x2b   : > { %p1106_p0 = scmp.lt.s32.totalorder %s744_s15, 3  ;;  %p1107_p1 = scmp.ge.s32.totalorder %s744_s15, 1 }
  0x2d   : > { %p155_p3 = pnand %p1107_p1, %p1106_p0 }
  0x2e   : > { %s883_s29 = sand.u32 (!%p155_p3), 1, %s736_s13  }
  0x2f   : > { %158 = sbr.rel (%p155_p3) target bundleno = 433 (0x1b1), region = 32  ;;  %s535_s30 = sshll.u32 (!%p155_p3), %s883_s29, 3 }
  0x30   : > { %s161_s5 = scalar_lea.sflag (!%p155_p3), [#allocation3], %s883_s29  ;;  %s164_s7 = scalar_lea.vmem (!%p155_p3), [#allocation2], %s535_s30 }
  0x36   : > { %723 = dma.done.wait (%p821_p6), %s161_s5, 128  }
  0x37   : > { %725 = vsyncadd (%p821_p6), %s161_s5, 4294967168  ;;  %v210_v0 = vld [vmem:[%s164_s7] sm:$0xff]  ;;  %s747_s4 = smov 17   ;;  %s748_s6 = smov 1   ;;  %v755_v4 = vmov 0.0   ;;  %v756_v5 = vmov 0   ;;  %v187_v7 = vlaneseq }
  0x38   : > { %v893_v1 = vmax.f32 %v210_v0, 0.0  ;;  %s749_s8 = smov 15   ;;  %s750_s9 = smov 16   ;;  %431 = vmatprep.mubr.f32.mxu0 %v755_v4  ;;  %646 = vset.pattern.permute.xlu1 %v756_v5  ;;  %v209_v6 = vld [vmem:[%s1098_s2] sm:$0xf]  ;;  %vm343_vm11 = vcmask 1043456  }
  0x39   : > { %s751_s23 = smov 127   ;;  %s752_s10 = smov 112   ;;  %647 = vset.pattern.permute.xlu0 %v756_v5  ;;  %v906_v8 = vand.u32 127, %v187_v7 }
  0x3a   : > { %v897_v2 = vcombine.high %v893_v1, %v893_v1  ;;  %s753_s11 = smov 113   ;;  %s754_s17 = smov 111  }
  0x3b   : > { %v909_v9 = vadd.s32 128, %v906_v8  ;;  %v190_v10 = vand.u32 15, %v906_v8  ;;  %vm258_vm0 = vcmp.lt.s32.totalorder %v906_v8, 1  ;;  %vm232_vm1 = vcmp.lt.s32.totalorder %v906_v8, 16  ;;  %s546_s27 = sshll.u32 %s799_s16, 7  ;;  %s186_s28 = scalar_lea.vmem [#allocation5], %s535_s30 }
  0x3c   : > { %v621_v3 = vpack.i.bf16 %v897_v2, %v893_v1  ;;  %vm219_vm3 = vcmp.lt.s32.totalorder %v906_v8, 17  ;;  %vm245_vm5 = vcmp.lt.s32.totalorder %v906_v8, 15  ;;  %vm192_vm6 = vcmp.ge.s32.totalorder %v906_v8, 16  ;;  %s458_s5 = sshll.u32 %s186_s28, 4  ;;  %p1124_p11 = scmp.ne.s32.totalorder %s1103_s24, 0  ;;  %s1054_s5 = int_to_ptr.vmem [resolvable:$true] %s458_s5 }
  0x3d   : > { %v191_v11 = vand.u32 15, %v909_v9  ;;  %vm915_vm2 = vcmp.lt.s32.totalorder %v190_v10, 15  ;;  %vm926_vm7 = vcmp.ge.s32.totalorder %v190_v10, 1  ;;  %vm271_vm8 = vcmp.lt.s32.totalorder %v906_v8, 127  ;;  %s757_s16 = smov [#allocation5]  }
  0x3e   : > { %622 = vrot.lane.b32.xlu1 %v621_v3, %s747_s4  ;;  %612 = vrot.lane.b32.xlu0 %v621_v3, %s748_s6  ;;  %vm195_vm9 = vcmp.lt.s32.totalorder %v909_v9, 240  ;;  %vm946_vm12 = vmand %vm192_vm6, %vm926_vm7  ;;  %vm297_vm13 = vcmp.lt.s32.totalorder %v906_v8, 112  ;;  %vm284_vm14 = vcmp.lt.s32.totalorder %v906_v8, 113  ;;  %vm310_vm15 = vcmp.lt.s32.totalorder %v906_v8, 111  ;;  %s1052_s6 = scalar_lea.hbm %s1099_s3, %s546_s27  ;;  %s682_s30 = sshll.u32 %s757_s16, 4  ;;  %s683_s30 = int_to_ptr.vmem [resolvable:$false] %s682_s30 }
  0x3f   : > { %vm920_vm4 = vcmp.ge.s32.totalorder %v191_v11, 1  ;;  %vm932_vm10 = vcmp.lt.s32.totalorder %v191_v11, 15  ;;  %p685_p7 = scmp.lt.s32.totalorder %s1054_s5, %s683_s30 }
  0x42   : > { %627 = vrot.lane.b32.xlu1 %v621_v3, %s749_s8  ;;  %617 = vrot.lane.b32.xlu0 %v621_v3, %s750_s9  ;;  %s444_s8 = scalar_lea.sflag [#allocation4], %s883_s29  ;;  %s678_s9 = scalar_lea.vmem %s1054_s5, 128 }
  0x43   : > { %p679_p6 = scmp.ne.s32.totalorder %s1054_s5, %s678_s9 }
  0x45   : > { %p680_p12 = pnand %p679_p6, %p1124_p11 }
  0x46   : > { %632 = vrot.lane.b32.xlu0 %v621_v3, %s751_s23  ;;  %637 = vrot.lane.b32.xlu1 %v621_v3, %s752_s10  ;;  %s684_s23 = scalar_lea.vmem %s683_s30, 256 }
  0x47   : > { %p681_p13 = pneg %p680_p12  ;;  %p686_p10 = scmp.lt.s32.totalorder %s684_s23, %s678_s9 }
  0x49   : > { %p687_p2 = por %p686_p10, %p685_p7 }
  0x4a   : > { %642 = vrot.lane.b32.xlu0 %v621_v3, %s753_s11  ;;  %306 = vrot.lane.b32.xlu1 %v893_v1, %s754_s17 }
  0x4b   : > { %p688_p4 = pnand %p687_p2, %p681_p13 }
  0x4e   : > { %308 = vrot.lane.b32.xlu0 %v897_v2, %s754_s17  ;;  %354 = vperm.xlu1 %646, %v209_v6  }
  0xb0   : > { %v623_v13 = vpop.permute.xlu1 %622  ;;  %v613_v14 = vpop.permute.xlu0 %612 }
  0xb1   : > { %v625_v17 = vunpack.i.h.bf16 %v623_v13  ;;  %v624_v18 = vunpack.i.l.bf16 %v623_v13  ;;  %v615_v19 = vunpack.i.h.bf16 %v613_v14  ;;  %v614_v20 = vunpack.i.l.bf16 %v613_v14 }
  0xb3   : > { %v259_v22 = vsel %vm258_vm0, %v614_v20, %v615_v19  ;;  %v260_v23 = vsel %vm258_vm0, %v615_v19, %v614_v20  ;;  %v220_v24 = vsel %vm219_vm3, %v624_v18, %v625_v17  ;;  %v221_v26 = vsel %vm219_vm3, %v625_v17, %v624_v18  ;;  %vm973_vm0 = vmand %vm192_vm6, %vm915_vm2 }
  0xb4   : > { %v628_v27 = vpop.permute.xlu1 %627  ;;  %v618_v28 = vpop.permute.xlu0 %617  ;;  %v266_v29 = vsel %vm920_vm4, %v259_v22, 0.0  ;;  %v265_v30 = vsel %vm926_vm7, %v260_v23, 0.0  ;;  %v227_v35 = vsel %vm920_vm4, %v220_v24, 0.0  ;;  %v226_v37 = vsel %vm946_vm12, %v221_v26, 0.0  ;;  %vm1021_vm3 = vmand %vm195_vm9, %vm932_vm10 }
  0xb5   : > { %v630_v31 = vunpack.i.h.bf16 %v628_v27  ;;  %v629_v32 = vunpack.i.l.bf16 %v628_v27  ;;  %v620_v33 = vunpack.i.h.bf16 %v618_v28  ;;  %v619_v34 = vunpack.i.l.bf16 %v618_v28 }
  0xb6   : > { %v328_v36 = vrot.slane %v266_v29, 4  ;;  %v327_v48 = vrot.slane %v265_v30, 4 }
  0xb7   : > { %v234_v38 = vsel %vm232_vm1, %v620_v33, %v619_v34  ;;  %v233_v39 = vsel %vm232_vm1, %v619_v34, %v620_v33  ;;  %v246_v40 = vsel %vm245_vm5, %v629_v32, %v630_v31  ;;  %v247_v42 = vsel %vm245_vm5, %v630_v31, %v629_v32  ;;  %vm1005_vm1 = vmand %vm195_vm9, %vm920_vm4  ;;  %v208_v31 = vld [vmem:[%s1097_s1] sm:$0xf] }
  0xb8   : > { %v633_v43 = vpop.permute.xlu0 %632  ;;  %v638_v44 = vpop.permute.xlu1 %637  ;;  %v253_v45 = vsel %vm932_vm10, %v246_v40, 0.0  ;;  %v322_v46 = vrot.slane %v233_v39, 4  ;;  %v239_v47 = vsel %vm192_vm6, %v234_v38, 0.0  ;;  %v252_v55 = vsel %vm973_vm0, %v247_v42, 0.0 }
  0xb9   : > { %v635_v49 = vunpack.i.h.bf16 %v633_v43  ;;  %v634_v50 = vunpack.i.l.bf16 %v633_v43  ;;  %v640_v51 = vunpack.i.h.bf16 %v638_v44  ;;  %v639_v52 = vunpack.i.l.bf16 %v638_v44 }
  0xba   : > { %v345_v53 = vsel %vm343_vm11, %v227_v35, %v322_v46  ;;  %v347_v54 = vsel %vm343_vm11, %v253_v45, %v328_v36  ;;  %v321_v56 = vrot.slane %v239_v47, 4  ;;  %v346_v17 = vsel %vm343_vm11, %v252_v55, %v327_v48 }
  0xbb   : > { %v272_v57 = vsel %vm271_vm8, %v634_v50, %v635_v49  ;;  %v273_v58 = vsel %vm271_vm8, %v635_v49, %v634_v50  ;;  %v298_v59 = vsel %vm297_vm13, %v639_v52, %v640_v51  ;;  %v299_v60 = vsel %vm297_vm13, %v640_v51, %v639_v52 }
  0xbc   : > { %v278_v61 = vsel %vm915_vm2, %v272_v57, 0.0  ;;  %v305_v62 = vsel %vm195_vm9, %v299_v60, 0.0  ;;  %v339_v63 = vrot.slane %v298_v59, 4  ;;  %v643_v0 = vpop.permute.xlu0 %642  ;;  %v279_v3 = vsel %vm932_vm10, %v273_v58, 0.0  ;;  %v307_v18 = vpop.permute.xlu1 %306 }
  0xbd   : > { %v333_v4 = vrot.slane %v278_v61, 4  ;;  %v340_v5 = vrot.slane %v305_v62, 4  ;;  %v645_v6 = vunpack.i.h.bf16 %v643_v0  ;;  %v644_v7 = vunpack.i.l.bf16 %v643_v0 }
  0xbe   : > { %v334_v11 = vrot.slane %v279_v3, 4  ;;  %v547_v13 = vpack.c.bf16 %v347_v54, %v345_v53  ;;  %v344_v14 = vsel %vm343_vm11, %v226_v37, %v321_v56  ;;  %vm357_vm4 = vcmask 293888  }
  0xbf   : > { %v285_v19 = vsel %vm284_vm14, %v644_v7, %v645_v6  ;;  %v286_v20 = vsel %vm284_vm14, %v645_v6, %v644_v7  ;;  %v549_v15 = vpack.c.bf16 %v346_v17, %v344_v14  ;;  %v348_v26 = vsel %vm343_vm11, %v893_v1, %v333_v4 }
  0xc0   : > { %548 = vmatprep.subr.bf16.mxu0 %v547_v13  ;;  %v292_v22 = vsel %vm1005_vm1, %v286_v20, 0.0  ;;  %v309_v24 = vpop.permute.xlu0 %308  ;;  %v291_v25 = vsel %vm926_vm7, %v285_v19, 0.0  ;;  %v349_v27 = vsel %vm343_vm11, %v897_v2, %v334_v11 }
  0xc1   : > { %550 = vmatpush1.bf16.msra.mxu0 %v549_v15  ;;  %v351_v28 = vsel %vm343_vm11, %v292_v22, %v340_v5  ;;  %v312_v9 = vsel %vm310_vm15, %v309_v24, %v307_v18  ;;  %v350_v21 = vsel %vm343_vm11, %v291_v25, %v339_v63  ;;  %v311_v16 = vsel %vm310_vm15, %v307_v18, %v309_v24 }
  0xc2   : > { %v551_v29 = vpack.c.bf16 %v351_v28, %v349_v27  ;;  %v553_v30 = vpack.c.bf16 %v350_v21, %v348_v26  ;;  %v318_v1 = vsel %vm1021_vm3, %v312_v9, 0.0  ;;  %v317_v2 = vsel %vm915_vm2, %v311_v16, 0.0 }
  0xc4   : > { %552 = vmatprep.subr.bf16.mxu0 %v551_v29 }
  0xc5   : > { %554 = vmatpush1.bf16.msra.mxu0 %v553_v30 }
  0xc6   : > { %537 = vmatprep.subr.msk.mxu0 %vm343_vm11, %v318_v1 }
  0xc9   : > { %538 = vmatpush1.msk.msra.mxu0 %vm343_vm11, %v317_v2 }
  0xca   : > { %539 = vmatmul.mubr.msk.f32.vlgmr.msra.gmra.mrb[0].mxu0 %vm357_vm4, %v208_v31 }
  0xcd   : > { %v355_v8 = vpop.permute.xlu1 %354 }
 0x19d   : > { %v433_v32 = vpop.f32.mrb[0].mxu0 }
 0x19e   : > { %v434_v33 = vadd.f32 %v433_v32, %v355_v8  ;;  %v435_v34 = vpop.f32.mrb[1].mxu0 }
 0x19f   : > { %v436_v12 = vadd.f32 %v435_v34, %v355_v8 }
 0x1a1   : > { %v440_v35 = vcombine.low %v434_v33, %v436_v12 }
 0x1a3   : > { %442 = vst [vmem:[%s186_s28] sm:$0xff] %v440_v35 }
 0x1a4   : > { %691 = shalt.err (!%p688_p4)
}
 0x1a5   : > { %s692_s29 = scalar_lea.hbm %s1052_s6, 128  ;;  %s696_s17 = scalar_lea.hbm %s1099_s3, 256 }
 0x1a6   : > { %p693_p5 = scmp.ne.s32.totalorder %s1052_s6, %s692_s29  ;;  %p697_p0 = scmp.lt.u32.totalorder %s1052_s6, %s1099_s3 }
 0x1a7   : > { %p698_p1 = scmp.lt.u32.totalorder %s696_s17, %s692_s29  ;;  %p700_p6 = scmp.lt.u32.totalorder %s692_s29, %s1052_s6 }
 0x1a8   : > { %p694_p8 = pnand %p693_p5, %p1124_p11 }
 0x1a9   : > { %p699_p3 = por %p698_p1, %p697_p0 }
 0x1aa   : > { %p695_p9 = pneg %p694_p8 }
 0x1ab   : > { %p701_p12 = por %p700_p6, %p699_p3 }
 0x1ad   : > { %p702_p13 = pnand %p701_p12, %p695_p9 }
 0x1af   : > { %705 = shalt.err (!%p702_p13)
}
 0x1b0   : > { %557 = dma.vmem_to_hbm [thread:$0]  (%p1124_p11), %s1054_s5, 128, %s1052_s6, %s444_s8  }
 0x1b1 PF: > { %s470_s22 = sand.u32 1, %s732_s12   ;;  %p1125_p7 = scmp.ne.s32.totalorder %s1104_s25, 0 }
 0x1b2   : > { %p1126_p10 = scmp.ge.s32.totalorder %s744_s15, 2  ;;  %s471_s26 = scalar_lea.sflag [#allocation4], %s470_s22 }
 0x1b4   : > { %p564_p2 = pnand %p1126_p10, %p1125_p7 }
 0x1b6   : > { %727 = dma.done.wait (!%p564_p2), %s471_s26, 128  }
 0x1b7   : > { %729 = vsyncadd (!%p564_p2), %s471_s26, 4294967168  ;;  %p16_p4 = scmp.ge.s32.totalorder %s803_s18, 4   ;;  %s1127_s12 = smov %s736_s13 }
 0x1b8   : > { %s1128_s13 = smov %s740_s14  ;;  %s1129_s14 = smov %s815_s21 }
 0x1b9   : > { %s1130_s15 = smov %s803_s18  ;;  %18 = sbr.rel (!%p16_p4) target bundleno = 5 (0x5), region = 77 }
 0x1c0   :  { %476 = vsyncpa [#allocation3], 1 }
 0x1c1   :  { %478 = vsyncpa [#allocation3 + $0x1], 1 }
 0x1c2   :  { %479 = vsyncpa [#allocation4], 1 }
 0x1c3   :  { %481 = vsyncpa [#allocation4 + $0x1], 1 }

</bundles_post_ra>
